<compile_context>
chip_gen: v5e
topology: v5e:2x2
jax: 0.10.0
libtpu: 0.0.40
codegen_flags: <defaults>
</compile_context>

<pallas_src>
import functools

import jax
import jax.numpy as jnp
from jax.experimental import pallas as pl
from jax.experimental.pallas import tpu as pltpu


def _round_up(x, m):
    return (x + m - 1) // m * m


def _vmem_capacity_bytes():
    """Physical VMEM per TensorCore; conservative fallback if query fails."""
    try:
        return int(pltpu.get_tpu_info().vmem_capacity_bytes)
    except Exception:
        return 64 * 1024 * 1024   # v7x per-TC (smallest of v5e/v6e/v7x)


def _pick_tm(batch, compute_dtype):
    """Batch-tile rows: sublane-aligned, padding-minimizing, overhead-amortizing."""
    sub = 16 if jnp.dtype(compute_dtype).itemsize == 2 else 8   # bf16 packs [16,128]
    b_al = _round_up(batch, sub)
    if b_al <= 256:
        # Small batch: single tile (padding beyond sublane alignment is pure
        # waste) -- but split into two balanced tiles when big enough so both
        # v7x TensorCores get work (no effect on single-TC v5e/v6e).
        if b_al >= 128 and (b_al // 2) % sub == 0:
            return b_al // 2
        return b_al
    # Large batch: prefer big tiles (amortize ~0.35us/step), but not at the
    # cost of lots of dead padded rows.
    candidates = (512, 256, 128)
    return min(candidates, key=lambda t: (_round_up(b_al, t) - batch, -t))


def _make_mlp_kernel(num_layers):
    """Kernel refs: x, w_0..w_{L-1}, s_0..s_{L-1}, out."""
    def kernel(*refs):
        x_ref = refs[0]
        w_refs = refs[1:1 + num_layers]
        s_refs = refs[1 + num_layers:1 + 2 * num_layers]
        o_ref = refs[1 + 2 * num_layers]
        h = x_ref[...]                               # (tm, Kp_0) compute dtype
        for l in range(num_layers):                  # unrolled (small L)
            w = w_refs[l][...]                       # (Kp_l, Np_l)
            # MXU matmul with f32 accumulation; epilogue (shift + ReLU) in f32.
            y = jnp.dot(h.astype(w.dtype), w, preferred_element_type=jnp.float32)
            h = jnp.maximum(y + s_refs[l][...], 0.0)
        o_ref[...] = h.astype(o_ref.dtype)
    return kernel


def _resident_spec(shape):
    """Full-array block, constant index_map, single-buffered (it never changes)."""
    idx = lambda i: (0,) * len(shape)
    try:
        return pl.BlockSpec(shape, idx, pipeline_mode=pl.Buffered(1))
    except Exception:
        # Older jax without pipeline_mode: fall back to default buffering.
        return pl.BlockSpec(shape, idx)


def _fused_mlp(xp, w_list, s_list, *, tm):
    """xp: [Bp, Kp0]; w_list[l]: [Kp_l, Np_l]; s_list[l]: [1, Np_l] -> [Bp, Np_last] f32."""
    bp, kp0 = xp.shape
    num_layers = len(w_list)
    np_last = w_list[-1].shape[1]
    cdt_size = jnp.dtype(xp.dtype).itemsize

    # ---- exact VMEM budget -------------------------------------------------
    w_bytes = sum(w.size * jnp.dtype(w.dtype).itemsize for w in w_list)   # x1 (Buffered(1))
    s_bytes = sum(s.size * 4 for s in s_list)                             # x1
    io_bytes = 2 * tm * kp0 * cdt_size + 2 * tm * np_last * 4            # double-buffered tiles
    act_bytes = 3 * tm * max(w.shape[1] for w in w_list) * 4             # layer temporaries
    needed = w_bytes + s_bytes + io_bytes + act_bytes

    cap = int(_vmem_capacity_bytes() * 0.85)        # headroom for Mosaic scratch
    if needed > cap:
        # TODO(synk): per-layer K-tiled matmul fallback for huge networks.
        raise ValueError(f"fused MLP needs ~{needed} B VMEM, only {cap} B usable")
    vmem_limit = int(min(cap, max(needed + 4 * 1024 * 1024, 32 * 1024 * 1024)))

    in_specs = [pl.BlockSpec((tm, kp0), lambda i: (i, 0))]                # batch tile
    in_specs += [_resident_spec(w.shape) for w in w_list]                 # weights
    in_specs += [_resident_spec(s.shape) for s in s_list]                 # shifts

    return pl.pallas_call(
        _make_mlp_kernel(num_layers),
        out_shape=jax.ShapeDtypeStruct((bp, np_last), jnp.float32),
        grid=(bp // tm,),
        in_specs=in_specs,
        out_specs=pl.BlockSpec((tm, np_last), lambda i: (i, 0)),
        compiler_params=pltpu.CompilerParams(
            dimension_semantics=("parallel",),       # batch tiles -> 2 TCs on v7x
            vmem_limit_bytes=vmem_limit,
        ),
    )(xp, *w_list, *s_list)


def prepare_mlp_params(params, bn_params, *, eps=1e-5, compute_dtype=jnp.bfloat16):
    """One-time: fold eval-mode BN + bias into (W', shift'), pad each layer to
    its own lane-dense shape, cast weights to the compute dtype.  Call once and
    reuse across forwards (this is layout plumbing, not per-call work)."""
    num_layers = len(params)
    w_list, s_list = [], []
    for i in range(num_layers):
        w = params[i]["w"].astype(jnp.float32)
        b = params[i]["b"].astype(jnp.float32)
        if i < num_layers - 1:
            bn = bn_params[i]
            scale = bn["gamma"] * jax.lax.rsqrt(bn["var"] + eps)
            shift = bn["beta"] - bn["mean"] * scale
            w = w * scale[None, :]
            s = b * scale + shift
        else:
            s = b
        k, n = w.shape
        kp, np_ = _round_up(k, 128), _round_up(n, 128)
        # Zero padding is exact: padded weight rows/cols are 0, padded shifts 0,
        # and ReLU(0)=0, so padded lanes stay 0 through every layer.
        wp = jnp.zeros((kp, np_), jnp.float32).at[:k, :n].set(w).astype(compute_dtype)
        sp = jnp.zeros((1, np_), jnp.float32).at[0, :n].set(s)     # f32 epilogue
        w_list.append(wp)
        s_list.append(sp)
    return tuple(w_list), tuple(s_list)


@functools.partial(jax.jit, static_argnames=("out_dim",))
def mlp_forward(x, w_list, s_list, out_dim):
    """Per-call path: pad the batch, launch the fused kernel, slice the result."""
    batch, in_dim = x.shape
    cdt = w_list[0].dtype
    kp0 = w_list[0].shape[0]
    tm = _pick_tm(batch, cdt)
    bp = _round_up(batch, tm)
    xp = jnp.zeros((bp, kp0), cdt).at[:batch, :in_dim].set(x.astype(cdt))
    out = _fused_mlp(xp, tuple(w_list), tuple(s_list), tm=tm)
    return out[:batch, :out_dim]


def init_mlp_params(key, input_dim, hidden_dim, output_dim, num_layers):
    """Deterministic synthetic init matching the PyTorch module's shapes."""
    h = [hidden_dim] * (num_layers - 1)
    in_dims = [input_dim] + h
    out_dims = h + [output_dim]
    params = []
    for n_in, n_out in zip(in_dims, out_dims):
        key, kw, kb = jax.random.split(key, 3)
        bound = 1.0 / jnp.sqrt(n_in)
        # stored as [in, out] (transpose of PyTorch's [out, in])
        w = jax.random.uniform(kw, (n_in, n_out), jnp.float32, -bound, bound)
        b = jax.random.uniform(kb, (n_out,), jnp.float32, -bound, bound)
        params.append({"w": w, "b": b})
    bn_params = []
    for _ in range(num_layers - 1):
        key, kg, kbeta, km, kv = jax.random.split(key, 5)
        gamma = 1.0 + 0.1 * jax.random.normal(kg, (hidden_dim,), jnp.float32)
        beta = 0.1 * jax.random.normal(kbeta, (hidden_dim,), jnp.float32)
        running_mean = 0.1 * jax.random.normal(km, (hidden_dim,), jnp.float32)
        running_var = 1.0 + 0.1 * jax.random.uniform(kv, (hidden_dim,), jnp.float32)
        bn_params.append(
            {"gamma": gamma, "beta": beta, "mean": running_mean, "var": running_var}
        )
    return params, bn_params


def mlp_reference(x, params, bn_params, eps=1e-5):
    """Pure-JAX reference (eval-mode semantics) for sanity checking."""
    num_layers = len(params)
    for i in range(num_layers):
        y = x @ params[i]["w"] + params[i]["b"]
        if i < num_layers - 1:
            bn = bn_params[i]
            y = (y - bn["mean"]) / jnp.sqrt(bn["var"] + eps) * bn["gamma"] + bn["beta"]
        x = jnp.maximum(y, 0.0)
    return x


if __name__ == "__main__":
    # small shapes consistent with the module's forward
    batch = 8
    input_dim = 32
    hidden_dim = 32
    output_dim = 16
    num_layers = 3

    key = jax.random.PRNGKey(0)
    key, kx = jax.random.split(key)
    x = jax.random.normal(kx, (batch, input_dim), jnp.float32)

    params, bn_params = init_mlp_params(
        key, input_dim, hidden_dim, output_dim, num_layers)

    ref = mlp_reference(x, params, bn_params)

    # ---- f32-operand path (exact; works on v5e/v6e/v7x) -------------------
    w_f32, s_f32 = prepare_mlp_params(params, bn_params, compute_dtype=jnp.float32)
    out = jax.block_until_ready(mlp_forward(x, w_f32, s_f32, out_dim=output_dim))
    assert out.shape == (batch, output_dim)
    assert jnp.allclose(out, ref, atol=1e-4, rtol=1e-4)

    # ---- bf16-operand default fast path (f32 accumulation + f32 epilogue) --
    # NOTE: error grows mildly with depth/width from per-layer bf16 re-casts.
    w_bf16, s_bf16 = prepare_mlp_params(params, bn_params)   # default bf16
    out_bf16 = jax.block_until_ready(
        mlp_forward(x, w_bf16, s_bf16, out_dim=output_dim))
    assert out_bf16.shape == (batch, output_dim)
    assert jnp.allclose(out_bf16, ref, atol=1e-1, rtol=1e-1)

    print("KERNEL_OK")
</pallas_src>

<mosaic_0001>
module attributes {stable_mosaic.version = 11 : i64} {
  func.func @kernel(%arg0: i32, %arg1: memref<8x128xf32, #tpu.memory_space<vmem>>, %arg2: memref<128x128xf32, #tpu.memory_space<vmem>>, %arg3: memref<128x128xf32, #tpu.memory_space<vmem>>, %arg4: memref<128x128xf32, #tpu.memory_space<vmem>>, %arg5: memref<1x128xf32, #tpu.memory_space<vmem>>, %arg6: memref<1x128xf32, #tpu.memory_space<vmem>>, %arg7: memref<1x128xf32, #tpu.memory_space<vmem>>, %arg8: memref<8x128xf32, #tpu.memory_space<vmem>>) attributes {dimension_semantics = [#tpu.dimension_semantics<parallel>], iteration_bounds = array<i64: 1>, scalar_prefetch = 0 : i64, scratch_operands = 0 : i64, tpu.core_type = #tpu.core_type<tc>, window_params = [{transform_indices = @transform_0, window_bounds = array<i64: 8, 128>}, {pipeline_mode = #tpu.pipeline_mode<synchronous>, transform_indices = @transform_1, window_bounds = array<i64: 128, 128>}, {pipeline_mode = #tpu.pipeline_mode<synchronous>, transform_indices = @transform_2, window_bounds = array<i64: 128, 128>}, {pipeline_mode = #tpu.pipeline_mode<synchronous>, transform_indices = @transform_3, window_bounds = array<i64: 128, 128>}, {pipeline_mode = #tpu.pipeline_mode<synchronous>, transform_indices = @transform_4, window_bounds = array<i64: 1, 128>}, {pipeline_mode = #tpu.pipeline_mode<synchronous>, transform_indices = @transform_5, window_bounds = array<i64: 1, 128>}, {pipeline_mode = #tpu.pipeline_mode<synchronous>, transform_indices = @transform_6, window_bounds = array<i64: 1, 128>}, {transform_indices = @transform_7, window_bounds = array<i64: 8, 128>}]} {
    %c0 = arith.constant 0 : index
    %c0_0 = arith.constant 0 : index
    %0 = vector.load %arg1[%c0, %c0_0] : memref<8x128xf32, #tpu.memory_space<vmem>>, vector<8x128xf32>
    %c0_1 = arith.constant 0 : index
    %c0_2 = arith.constant 0 : index
    %1 = vector.load %arg2[%c0_1, %c0_2] : memref<128x128xf32, #tpu.memory_space<vmem>>, vector<128x128xf32>
    %cst = arith.constant dense<0.000000e+00> : vector<8x128xf32>
    %2 = tpu.matmul %0, %1, %cst {dimension_numbers = #tpu.dot_dimension_numbers<[1], [0], [0], [1], [0, 0, 1, 1], [], []>} : vector<8x128xf32>, vector<128x128xf32>, vector<8x128xf32> -> vector<8x128xf32>
    %c0_3 = arith.constant 0 : index
    %c0_4 = arith.constant 0 : index
    %3 = vector.load %arg5[%c0_3, %c0_4] : memref<1x128xf32, #tpu.memory_space<vmem>>, vector<1x128xf32>
    %4 = vector.broadcast %3 : vector<1x128xf32> to vector<8x128xf32>
    %5 = arith.addf %2, %4 : vector<8x128xf32>
    %cst_5 = arith.constant 0.000000e+00 : f32
    %6 = vector.broadcast %cst_5 : f32 to vector<8x128xf32>
    %7 = arith.maximumf %5, %6 : vector<8x128xf32>
    %c0_6 = arith.constant 0 : index
    %c0_7 = arith.constant 0 : index
    %8 = vector.load %arg3[%c0_6, %c0_7] : memref<128x128xf32, #tpu.memory_space<vmem>>, vector<128x128xf32>
    %cst_8 = arith.constant dense<0.000000e+00> : vector<8x128xf32>
    %9 = tpu.matmul %7, %8, %cst_8 {dimension_numbers = #tpu.dot_dimension_numbers<[1], [0], [0], [1], [0, 0, 1, 1], [], []>} : vector<8x128xf32>, vector<128x128xf32>, vector<8x128xf32> -> vector<8x128xf32>
    %c0_9 = arith.constant 0 : index
    %c0_10 = arith.constant 0 : index
    %10 = vector.load %arg6[%c0_9, %c0_10] : memref<1x128xf32, #tpu.memory_space<vmem>>, vector<1x128xf32>
    %11 = vector.broadcast %10 : vector<1x128xf32> to vector<8x128xf32>
    %12 = arith.addf %9, %11 : vector<8x128xf32>
    %cst_11 = arith.constant 0.000000e+00 : f32
    %13 = vector.broadcast %cst_11 : f32 to vector<8x128xf32>
    %14 = arith.maximumf %12, %13 : vector<8x128xf32>
    %c0_12 = arith.constant 0 : index
    %c0_13 = arith.constant 0 : index
    %15 = vector.load %arg4[%c0_12, %c0_13] : memref<128x128xf32, #tpu.memory_space<vmem>>, vector<128x128xf32>
    %cst_14 = arith.constant dense<0.000000e+00> : vector<8x128xf32>
    %16 = tpu.matmul %14, %15, %cst_14 {dimension_numbers = #tpu.dot_dimension_numbers<[1], [0], [0], [1], [0, 0, 1, 1], [], []>} : vector<8x128xf32>, vector<128x128xf32>, vector<8x128xf32> -> vector<8x128xf32>
    %c0_15 = arith.constant 0 : index
    %c0_16 = arith.constant 0 : index
    %17 = vector.load %arg7[%c0_15, %c0_16] : memref<1x128xf32, #tpu.memory_space<vmem>>, vector<1x128xf32>
    %18 = vector.broadcast %17 : vector<1x128xf32> to vector<8x128xf32>
    %19 = arith.addf %16, %18 : vector<8x128xf32>
    %cst_17 = arith.constant 0.000000e+00 : f32
    %20 = vector.broadcast %cst_17 : f32 to vector<8x128xf32>
    %21 = arith.maximumf %19, %20 : vector<8x128xf32>
    %c0_18 = arith.constant 0 : index
    %c0_19 = arith.constant 0 : index
    %22 = vector.load %arg8[%c0_18, %c0_19] : memref<8x128xf32, #tpu.memory_space<vmem>>, vector<8x128xf32>
    tpu.vector_store %arg8[%c0_18, %c0_19], %21 {strides = array<i32>} : memref<8x128xf32, #tpu.memory_space<vmem>>, vector<8x128xf32>,
    return
  }
  func.func @transform_0(%arg0: i32) -> (i32, i32) {
    %c0_i32 = arith.constant 0 : i32
    %c0_i32_0 = arith.constant 0 : i32
    return %arg0, %c0_i32 : i32, i32
  }
  func.func @transform_1(%arg0: i32) -> (i32, i32) {
    %c0_i32 = arith.constant 0 : i32
    %c0_i32_0 = arith.constant 0 : i32
    %c0_i32_1 = arith.constant 0 : i32
    return %c0_i32, %c0_i32_0 : i32, i32
  }
  func.func @transform_2(%arg0: i32) -> (i32, i32) {
    %c0_i32 = arith.constant 0 : i32
    %c0_i32_0 = arith.constant 0 : i32
    %c0_i32_1 = arith.constant 0 : i32
    return %c0_i32, %c0_i32_0 : i32, i32
  }
  func.func @transform_3(%arg0: i32) -> (i32, i32) {
    %c0_i32 = arith.constant 0 : i32
    %c0_i32_0 = arith.constant 0 : i32
    %c0_i32_1 = arith.constant 0 : i32
    return %c0_i32, %c0_i32_0 : i32, i32
  }
  func.func @transform_4(%arg0: i32) -> (i32, i32) {
    %c0_i32 = arith.constant 0 : i32
    %c0_i32_0 = arith.constant 0 : i32
    %c0_i32_1 = arith.constant 0 : i32
    return %c0_i32, %c0_i32_0 : i32, i32
  }
  func.func @transform_5(%arg0: i32) -> (i32, i32) {
    %c0_i32 = arith.constant 0 : i32
    %c0_i32_0 = arith.constant 0 : i32
    %c0_i32_1 = arith.constant 0 : i32
    return %c0_i32, %c0_i32_0 : i32, i32
  }
  func.func @transform_6(%arg0: i32) -> (i32, i32) {
    %c0_i32 = arith.constant 0 : i32
    %c0_i32_0 = arith.constant 0 : i32
    %c0_i32_1 = arith.constant 0 : i32
    return %c0_i32, %c0_i32_0 : i32, i32
  }
  func.func @transform_7(%arg0: i32) -> (i32, i32) {
    %c0_i32 = arith.constant 0 : i32
    %c0_i32_0 = arith.constant 0 : i32
    return %arg0, %c0_i32 : i32, i32
  }
}

</mosaic_0001>

<bundles_post_ra>
// kernel: mlp_forward.1
= control target key start
LH: loop header
LB: loop body
LE: loop exit
PB: predicated region body
PF: predicated region fallthrough
CT: control target
= control target key end

     0   :  { %12 = vsyncpa [#allocation3], 0  ;;  %s398_s0 = inlined_call_operand.vmem [shape: f32[8,128], index: 0, kind: input, shape index: {}]   ;;  %s399_s1 = inlined_call_operand.hbm [shape: f32[128,128], index: 1, kind: input, shape index: {}]   ;;  %s400_s2 = inlined_call_operand.hbm [shape: f32[128,128], index: 2, kind: input, shape index: {}]   ;;  %s401_s3 = inlined_call_operand.hbm [shape: f32[128,128], index: 3, kind: input, shape index: {}]   ;;  %s402_s4 = inlined_call_operand.vmem [shape: f32[1,128], index: 4, kind: input, shape index: {}]   ;;  %s403_s5 = inlined_call_operand.vmem [shape: f32[1,128], index: 5, kind: input, shape index: {}]   ;;  %s404_s6 = inlined_call_operand.vmem [shape: f32[1,128], index: 6, kind: input, shape index: {}]   ;;  %s405_s7 = inlined_call_operand.hbm [shape: f32[8,128], index: 7, kind: output, shape index: {}]  }
   0x1   :  { %13 = vsyncpa [#allocation6], 0 }
   0x2   :  { %14 = vsyncpa [#allocation4], 0  ;;  %s34_s26 = sshll.u32 %s400_s2, 4  ;;  %s328_s27 = smov [#allocation5]   ;;  %s35_s26 = int_to_ptr.hbm [resolvable:$true] %s34_s26 }
   0x3   :  { %s36_s28 = sshll.u32 %s328_s27, 4  ;;  %s21_s8 = sshll.u32 %s399_s1, 4  ;;  %s37_s28 = int_to_ptr.vmem [resolvable:$true] %s36_s28  ;;  %s22_s8 = int_to_ptr.hbm [resolvable:$true] %s21_s8 }
   0x4   :  { %s329_s9 = smov 128   ;;  %s330_s10 = smov 8  }
   0x5   :  { %42 = dma.hbm_to_vmem [thread:$0]  %s35_s26, 2048, %s37_s28, [#allocation6], %s329_s9, %s329_s9, %s330_s10  }
   0x6   :  { %s331_s11 = smov [#allocation2]   ;;  %s47_s15 = sshll.u32 %s401_s3, 4  ;;  %s48_s15 = int_to_ptr.hbm [resolvable:$true] %s47_s15 }
   0x7   :  { %s23_s12 = sshll.u32 %s331_s11, 4  ;;  %s332_s2 = smov [#allocation7]   ;;  %s24_s12 = int_to_ptr.vmem [resolvable:$true] %s23_s12 }
   0x8   :  { %29 = dma.hbm_to_vmem [thread:$0]  %s22_s8, 2048, %s24_s12, [#allocation3], %s329_s9, %s329_s9, %s330_s10  }
   0x9   :  { %s49_s16 = sshll.u32 %s332_s2, 4  ;;  %s50_s16 = int_to_ptr.vmem [resolvable:$true] %s49_s16 }
   0xa   :  { %55 = dma.hbm_to_vmem [thread:$0]  %s48_s15, 2048, %s50_s16, [#allocation6], %s329_s9, %s329_s9, %s330_s10  }
   0xb   :  { %322 = dma.done.wait [#allocation3], 2048  }
   0xc   :  { %323 = vsyncadd [#allocation3], 4294965248 }
   0xd   :  { %324 = dma.done.wait [#allocation6], 4096  }
   0xe   :  { %325 = vsyncadd [#allocation6], 4294963200  ;;  %v90_v0 = vld [vmem:[#allocation2 + $0x78] sm:$0xff]  ;;  %v89_v1 = vld [vmem:[#allocation2 + $0x70] sm:$0xff]  ;;  %s333_s21 = smov [#allocation8]   ;;  %s206_s25 = sshll.u32 %s405_s7, 4  ;;  %s207_s25 = int_to_ptr.hbm [resolvable:$true] %s206_s25 }
   0xf   :  { %95 = vmatpush.msra.mxu0 %v90_v0  ;;  %v88_v2 = vld [vmem:[#allocation2 + $0x68] sm:$0xff]  ;;  %v87_v3 = vld [vmem:[#allocation2 + $0x60] sm:$0xff]  ;;  %v131_v4 = vld [vmem:[#allocation5 + $0x78] sm:$0xff]  ;;  %s204_s22 = sshll.u32 %s333_s21, 4  ;;  %s205_s22 = int_to_ptr.vmem [resolvable:$true] %s204_s22 }
  0x10   :  { %v86_v5 = vld [vmem:[#allocation2 + $0x58] sm:$0xff]  ;;  %136 = vmatpush.msra.mxu1 %v131_v4  ;;  %v130_v6 = vld [vmem:[#allocation5 + $0x70] sm:$0xff]  ;;  %v129_v7 = vld [vmem:[#allocation5 + $0x68] sm:$0xff] }
  0x11   :  { %96 = vmatpush.msra.mxu0 %v89_v1  ;;  %v85_v8 = vld [vmem:[#allocation2 + $0x50] sm:$0xff]  ;;  %v128_v9 = vld [vmem:[#allocation5 + $0x60] sm:$0xff]  ;;  %v84_v10 = vld [vmem:[#allocation2 + $0x48] sm:$0xff] }
  0x12   :  { %137 = vmatpush.msra.mxu1 %v130_v6  ;;  %v127_v11 = vld [vmem:[#allocation5 + $0x58] sm:$0xff]  ;;  %v83_v12 = vld [vmem:[#allocation2 + $0x40] sm:$0xff]  ;;  %v126_v13 = vld [vmem:[#allocation5 + $0x50] sm:$0xff] }
  0x13   :  { %97 = vmatpush.msra.mxu0 %v88_v2  ;;  %v82_v14 = vld [vmem:[#allocation2 + $0x38] sm:$0xff]  ;;  %v125_v15 = vld [vmem:[#allocation5 + $0x48] sm:$0xff]  ;;  %v81_v16 = vld [vmem:[#allocation2 + $0x30] sm:$0xff] }
  0x14   :  { %138 = vmatpush.msra.mxu1 %v129_v7  ;;  %v124_v17 = vld [vmem:[#allocation5 + $0x40] sm:$0xff]  ;;  %v80_v18 = vld [vmem:[#allocation2 + $0x28] sm:$0xff]  ;;  %v123_v19 = vld [vmem:[#allocation5 + $0x38] sm:$0xff] }
  0x15   :  { %98 = vmatpush.msra.mxu0 %v87_v3  ;;  %v79_v20 = vld [vmem:[#allocation2 + $0x20] sm:$0xff]  ;;  %v122_v21 = vld [vmem:[#allocation5 + $0x30] sm:$0xff]  ;;  %v78_v22 = vld [vmem:[#allocation2 + $0x18] sm:$0xff] }
  0x16   :  { %139 = vmatpush.msra.mxu1 %v128_v9  ;;  %v121_v23 = vld [vmem:[#allocation5 + $0x28] sm:$0xff]  ;;  %v77_v24 = vld [vmem:[#allocation2 + $0x10] sm:$0xff]  ;;  %v120_v25 = vld [vmem:[#allocation5 + $0x20] sm:$0xff] }
  0x17   :  { %99 = vmatpush.msra.mxu0 %v86_v5  ;;  %v76_v26 = vld [vmem:[#allocation2 + $0x8] sm:$0xff]  ;;  %v119_v27 = vld [vmem:[#allocation5 + $0x18] sm:$0xff]  ;;  %v75_v28 = vld [vmem:[#allocation2] sm:$0xff] }
  0x18   :  { %140 = vmatpush.msra.mxu1 %v127_v11  ;;  %v74_v29 = vld [vmem:[%s398_s0] sm:$0xff]  ;;  %v118_v30 = vld [vmem:[#allocation5 + $0x10] sm:$0xff]  ;;  %v117_v31 = vld [vmem:[#allocation5 + $0x8] sm:$0xff] }
  0x19   :  { %100 = vmatpush.msra.mxu0 %v85_v8  ;;  %v116_v32 = vld [vmem:[#allocation5] sm:$0xff]  ;;  %v172_v33 = vld [vmem:[#allocation7 + $0x78] sm:$0xff]  ;;  %v171_v34 = vld [vmem:[#allocation7 + $0x70] sm:$0xff] }
  0x1a   :  { %141 = vmatpush.msra.mxu1 %v126_v13  ;;  %177 = vmatpush.msra.mxu2 %v172_v33  ;;  %v170_v35 = vld [vmem:[#allocation7 + $0x68] sm:$0xff]  ;;  %v169_v36 = vld [vmem:[#allocation7 + $0x60] sm:$0xff]  ;;  %v168_v37 = vld [vmem:[#allocation7 + $0x58] sm:$0xff] }
  0x1b   :  { %101 = vmatpush.msra.mxu0 %v84_v10  ;;  %v167_v38 = vld [vmem:[#allocation7 + $0x50] sm:$0xff]  ;;  %v166_v39 = vld [vmem:[#allocation7 + $0x48] sm:$0xff]  ;;  %v165_v40 = vld [vmem:[#allocation7 + $0x40] sm:$0xff] }
  0x1c   :  { %142 = vmatpush.msra.mxu1 %v125_v15  ;;  %178 = vmatpush.msra.mxu2 %v171_v34  ;;  %v164_v41 = vld [vmem:[#allocation7 + $0x38] sm:$0xff]  ;;  %v163_v42 = vld [vmem:[#allocation7 + $0x30] sm:$0xff]  ;;  %v162_v43 = vld [vmem:[#allocation7 + $0x28] sm:$0xff] }
  0x1d   :  { %102 = vmatpush.msra.mxu0 %v83_v12  ;;  %v161_v44 = vld [vmem:[#allocation7 + $0x20] sm:$0xff]  ;;  %v160_v45 = vld [vmem:[#allocation7 + $0x18] sm:$0xff]  ;;  %v159_v50 = vld [vmem:[#allocation7 + $0x10] sm:$0xff] }
  0x1e   :  { %143 = vmatpush.msra.mxu1 %v124_v17  ;;  %179 = vmatpush.msra.mxu2 %v170_v35  ;;  %v223_v46 = vld [vmem:[%s402_s4] ss:$0 sm:$0xff]  ;;  %v158_v51 = vld [vmem:[#allocation7 + $0x8] sm:$0xff] }
  0x1f   :  { %103 = vmatpush.msra.mxu0 %v82_v14  ;;  %v157_v52 = vld [vmem:[#allocation7] sm:$0xff] }
  0x20   :  { %144 = vmatpush.msra.mxu1 %v123_v19  ;;  %180 = vmatpush.msra.mxu2 %v169_v36  ;;  %v224_v53 = vld [vmem:[%s403_s5] ss:$0 sm:$0xff] }
  0x21   :  { %104 = vmatpush.msra.mxu0 %v81_v16  ;;  %v225_v57 = vld [vmem:[%s404_s6] ss:$0 sm:$0xff] }
  0x22   :  { %145 = vmatpush.msra.mxu1 %v122_v21  ;;  %181 = vmatpush.msra.mxu2 %v168_v37 }
  0x23   :  { %105 = vmatpush.msra.mxu0 %v80_v18 }
  0x24   :  { %146 = vmatpush.msra.mxu1 %v121_v23  ;;  %182 = vmatpush.msra.mxu2 %v167_v38 }
  0x25   :  { %106 = vmatpush.msra.mxu0 %v79_v20 }
  0x26   :  { %147 = vmatpush.msra.mxu1 %v120_v25  ;;  %183 = vmatpush.msra.mxu2 %v166_v39 }
  0x27   :  { %107 = vmatpush.msra.mxu0 %v78_v22 }
  0x28   :  { %148 = vmatpush.msra.mxu1 %v119_v27  ;;  %184 = vmatpush.msra.mxu2 %v165_v40 }
  0x29   :  { %108 = vmatpush.msra.mxu0 %v77_v24 }
  0x2a   :  { %149 = vmatpush.msra.mxu1 %v118_v30  ;;  %185 = vmatpush.msra.mxu2 %v164_v41 }
  0x2b   :  { %109 = vmatpush.msra.mxu0 %v76_v26 }
  0x2c   :  { %150 = vmatpush.msra.mxu1 %v117_v31  ;;  %186 = vmatpush.msra.mxu2 %v163_v42 }
  0x2d   :  { %110 = vmatpush.msra.mxu0 %v75_v28 }
  0x2e   :  { %111 = vmatmul.f32.vlgmr.msra.gmra.mxu0 %v74_v29  ;;  %151 = vmatpush.msra.mxu1 %v116_v32 }
  0x2f   :  { %187 = vmatpush.msra.mxu2 %v162_v43 }
  0x31   :  { %188 = vmatpush.msra.mxu2 %v161_v44 }
  0x33   :  { %189 = vmatpush.msra.mxu2 %v160_v45 }
  0x35   :  { %190 = vmatpush.msra.mxu2 %v159_v50 }
  0x37   :  { %191 = vmatpush.msra.mxu2 %v158_v51 }
  0x39   :  { %192 = vmatpush.msra.mxu2 %v157_v52 }
  0xab   :  { %v112_v47 = vpop.f32.mrf.mxu0 }
  0xac   :  { %v113_v48 = vadd.f32 %v223_v46, %v112_v47 }
  0xae   :  { %v115_v49 = vmax.f32 %v113_v48, 0.0 }
  0xb0   :  { %152 = vmatmul.f32.vlgmr.msra.gmra.mxu1 %v115_v49 }
 0x12d   :  { %v153_v54 = vpop.f32.mrf.mxu1 }
 0x12e   :  { %v154_v55 = vadd.f32 %v224_v53, %v153_v54 }
 0x130   :  { %v156_v56 = vmax.f32 %v154_v55, 0.0 }
 0x132   :  { %193 = vmatmul.f32.vlgmr.msra.gmra.mxu2 %v156_v56 }
 0x1b5   :  { %v194_v58 = vpop.f32.mrf.mxu2 }
 0x1b6   :  { %v195_v59 = vadd.f32 %v225_v57, %v194_v58 }
 0x1b8   :  { %v197_v60 = vmax.f32 %v195_v59, 0.0 }
 0x1ba   :  { %198 = vst [vmem:[#allocation8] sm:$0xff] %v197_v60 }
 0x1bb   :  { %209 = dma.vmem_to_hbm [thread:$0]  %s205_s22, 128, %s207_s25, [#allocation4]  }
 0x1bc   :  { %326 = dma.done.wait [#allocation4], 128  }
 0x1bd   :  { %327 = vsyncadd [#allocation4], 4294967168 }
 0x1be   :  { %214 = vsyncpa [#allocation3], 1 }
 0x1bf   :  { %215 = vsyncpa [#allocation6], 1 }
 0x1c0   :  { %216 = vsyncpa [#allocation4], 1 }

</bundles_post_ra>
